<compile_context>
chip_gen: v7x
topology: tpu7x:2x2x1
jax: 0.10.0
libtpu: 0.0.40
codegen_flags: <defaults>
</compile_context>

<pallas_src>
import jax
import jax.numpy as jnp
from jax import lax
from jax.experimental import pallas as pl
from jax.experimental.pallas import tpu as pltpu

EPS = 1e-5
GROUP = 8  # rows per grid step -> sublane-dense vregs and full-tile stores


def _emb_ln_kernel(ids_ref, emb_hbm, w_ref, b_ref, out_ref, row_buf, sems):
    # ids_ref : SMEM (B_pad,)      int32  (scalar prefetch)
    # emb_hbm : HBM  (V, H)        table dtype (never copied wholesale)
    # w_ref   : VMEM (1, H)        f32
    # b_ref   : VMEM (1, H)        f32
    # out_ref : VMEM (GROUP, H)    f32
    # row_buf : VMEM (GROUP, H)    table dtype (gather landing buffer)
    # sems    : DMA semaphores (GROUP,)
    g = pl.program_id(0)
    V = emb_hbm.shape[0]

    # Issue all GROUP row gathers from HBM concurrently (latency overlapped).
    for r in range(GROUP):  # GROUP is a small fixed constant (8) -> cheap unroll
        tok = ids_ref[g * GROUP + r]
        tok = jnp.minimum(jnp.maximum(tok, 0), V - 1)  # clamp: no OOB check on TPU
        pltpu.make_async_copy(
            emb_hbm.at[pl.ds(tok, 1), :],
            row_buf.at[pl.ds(r, 1), :],
            sems.at[r],
        ).start()
    for r in range(GROUP):
        pltpu.make_async_copy(
            emb_hbm.at[pl.ds(0, 1), :],
            row_buf.at[pl.ds(r, 1), :],
            sems.at[r],
        ).wait()

    # Batched LayerNorm over the whole (GROUP, H) block in f32.
    x = row_buf[...].astype(jnp.float32)
    mean = jnp.mean(x, axis=-1, keepdims=True)
    xc = x - mean
    var = jnp.mean(xc * xc, axis=-1, keepdims=True)
    inv = lax.rsqrt(var + EPS)
    y = xc * inv * w_ref[...] + b_ref[...]
    out_ref[...] = y.astype(out_ref.dtype)


def embedding_layernorm(input_ids, emb_table, ln_w, ln_b):
    """input_ids: [B, 1] int -> [B, H] f32 (embedding lookup + layer norm)."""
    B = input_ids.shape[0]
    V, H = emb_table.shape
    B_pad = ((B + GROUP - 1) // GROUP) * GROUP

    ids_flat = input_ids.reshape(B).astype(jnp.int32)
    ids_pad = jnp.pad(ids_flat, (0, B_pad - B))  # padded rows gather row 0; sliced off below
    w2 = ln_w.reshape(1, H).astype(jnp.float32)
    b2 = ln_b.reshape(1, H).astype(jnp.float32)

    out = pl.pallas_call(
        _emb_ln_kernel,
        out_shape=jax.ShapeDtypeStruct((B_pad, H), jnp.float32),
        grid_spec=pltpu.PrefetchScalarGridSpec(
            num_scalar_prefetch=1,
            grid=(B_pad // GROUP,),
            in_specs=[
                pl.BlockSpec(memory_space=pl.ANY),               # embedding table stays in HBM
                pl.BlockSpec((1, H), lambda g, ids: (0, 0)),     # ln weight (resident)
                pl.BlockSpec((1, H), lambda g, ids: (0, 0)),     # ln bias   (resident)
            ],
            out_specs=pl.BlockSpec((GROUP, H), lambda g, ids: (g, 0)),
            scratch_shapes=[
                pltpu.VMEM((GROUP, H), emb_table.dtype),         # gathered rows
                pltpu.SemaphoreType.DMA((GROUP,)),               # one sem per row DMA
            ],
        ),
        compiler_params=pltpu.CompilerParams(
            dimension_semantics=("parallel",),                   # v7x: split row-groups across TCs
        ),
    )(ids_pad, emb_table, w2, b2)   # NOTE: no wrapper-side .astype of the table
    return out[:B]


def _reference(input_ids, emb_table, ln_w, ln_b):
    x = jnp.take(emb_table, input_ids.reshape(-1), axis=0).astype(jnp.float32)
    mean = jnp.mean(x, axis=-1, keepdims=True)
    xc = x - mean
    var = jnp.mean(xc * xc, axis=-1, keepdims=True)
    return xc / jnp.sqrt(var + EPS) * ln_w[None, :].astype(jnp.float32) + b_ref_cast(ln_b)


def b_ref_cast(ln_b):
    return ln_b[None, :].astype(jnp.float32)


if __name__ == "__main__":
    # Small deterministic setup (synthetic weights; no checkpoint load).
    VOCAB = 64      # vocab size
    HIDDEN = 128    # n_embd
    BATCH = 4

    key = jax.random.PRNGKey(0)
    k_emb, k_w, k_b, k_ids = jax.random.split(key, 4)

    emb_table = jax.random.normal(k_emb, (VOCAB, HIDDEN), dtype=jnp.float32) * 0.02
    ln0_weight = 1.0 + 0.1 * jax.random.normal(k_w, (HIDDEN,), dtype=jnp.float32)
    ln0_bias = 0.1 * jax.random.normal(k_b, (HIDDEN,), dtype=jnp.float32)
    input_ids = jax.random.randint(k_ids, (BATCH, 1), 0, VOCAB, dtype=jnp.int32)

    out = embedding_layernorm(input_ids, emb_table, ln0_weight, ln0_bias)
    out = jax.block_until_ready(out)

    ref = _reference(input_ids, emb_table, ln0_weight, ln0_bias)
    assert out.shape == (BATCH, HIDDEN)
    assert jnp.allclose(out, ref, atol=1e-5, rtol=1e-5), "mismatch vs reference"

    print("KERNEL_OK")
</pallas_src>

<mosaic_0001>
module attributes {stable_mosaic.version = 11 : i64} {
  func.func @_emb_ln_kernel(%arg0: i32, %arg1: memref<8xi32, #tpu.memory_space<smem>>, %arg2: memref<64x128xf32, #tpu.memory_space<any>>, %arg3: memref<1x128xf32, #tpu.memory_space<vmem>>, %arg4: memref<1x128xf32, #tpu.memory_space<vmem>>, %arg5: memref<8x128xf32, #tpu.memory_space<vmem>>, %arg6: memref<8x128xf32, #tpu.memory_space<vmem>>, %arg7: memref<8x!tpu.dma_semaphore, #tpu.memory_space<semaphore_mem>>) attributes {dimension_semantics = [#tpu.dimension_semantics<parallel>], iteration_bounds = array<i64: 1>, scalar_prefetch = 1 : i64, scratch_operands = 2 : i64, tpu.core_type = #tpu.core_type<tc>, window_params = [{}, {pipeline_mode = #tpu.pipeline_mode<synchronous>, transform_indices = @transform_1, window_bounds = array<i64: 1, 128>}, {pipeline_mode = #tpu.pipeline_mode<synchronous>, transform_indices = @transform_2, window_bounds = array<i64: 1, 128>}, {transform_indices = @transform_3, window_bounds = array<i64: 8, 128>}]} {
    %c8_i32 = arith.constant 8 : i32
    %0 = arith.muli %arg0, %c8_i32 : i32
    %c0_i32 = arith.constant 0 : i32
    %1 = arith.addi %0, %c0_i32 : i32
    %2 = arith.index_cast %1 : i32 to index
    %3 = memref.load %arg1[%2] : memref<8xi32, #tpu.memory_space<smem>>
    %c0_i32_0 = arith.constant 0 : i32
    %4 = arith.maxsi %3, %c0_i32_0 : i32
    %c63_i32 = arith.constant 63 : i32
    %5 = arith.minsi %4, %c63_i32 : i32
    %c0_i32_1 = arith.constant 0 : i32
    %c0_i32_2 = arith.constant 0 : i32
    %6 = tpu.memref_slice %arg2[%5, %c0_i32_2] : memref<64x128xf32, #tpu.memory_space<any>> -> memref<1x128xf32, #tpu.memory_space<any>>
    %c0_i32_3 = arith.constant 0 : i32
    %c0_i32_4 = arith.constant 0 : i32
    %7 = tpu.memref_slice %arg6[%c0_i32_3, %c0_i32_4] : memref<8x128xf32, #tpu.memory_space<vmem>> -> memref<1x128xf32, #tpu.memory_space<vmem>>
    %8 = tpu.memref_slice %arg7[%c0_i32_1] : memref<8x!tpu.dma_semaphore, #tpu.memory_space<semaphore_mem>> -> memref<1x!tpu.dma_semaphore, #tpu.memory_space<semaphore_mem>>
    %9 = tpu.memref_squeeze %8 : memref<1x!tpu.dma_semaphore, #tpu.memory_space<semaphore_mem>> -> memref<!tpu.dma_semaphore, #tpu.memory_space<semaphore_mem>>
    tpu.enqueue_dma source(%6 : memref<1x128xf32, #tpu.memory_space<any>>) target(%7 : memref<1x128xf32, #tpu.memory_space<vmem>>) target_semaphore(%9 : memref<!tpu.dma_semaphore, #tpu.memory_space<semaphore_mem>>)
    %c8_i32_5 = arith.constant 8 : i32
    %10 = arith.muli %arg0, %c8_i32_5 : i32
    %c1_i32 = arith.constant 1 : i32
    %11 = arith.addi %10, %c1_i32 : i32
    %12 = arith.index_cast %11 : i32 to index
    %13 = memref.load %arg1[%12] : memref<8xi32, #tpu.memory_space<smem>>
    %c0_i32_6 = arith.constant 0 : i32
    %14 = arith.maxsi %13, %c0_i32_6 : i32
    %c63_i32_7 = arith.constant 63 : i32
    %15 = arith.minsi %14, %c63_i32_7 : i32
    %c1_i32_8 = arith.constant 1 : i32
    %c0_i32_9 = arith.constant 0 : i32
    %16 = tpu.memref_slice %arg2[%15, %c0_i32_9] : memref<64x128xf32, #tpu.memory_space<any>> -> memref<1x128xf32, #tpu.memory_space<any>>
    %c1_i32_10 = arith.constant 1 : i32
    %c0_i32_11 = arith.constant 0 : i32
    %17 = tpu.memref_slice %arg6[%c1_i32_10, %c0_i32_11] : memref<8x128xf32, #tpu.memory_space<vmem>> -> memref<1x128xf32, #tpu.memory_space<vmem>>
    %18 = tpu.memref_slice %arg7[%c1_i32_8] : memref<8x!tpu.dma_semaphore, #tpu.memory_space<semaphore_mem>> -> memref<1x!tpu.dma_semaphore, #tpu.memory_space<semaphore_mem>>
    %19 = tpu.memref_squeeze %18 : memref<1x!tpu.dma_semaphore, #tpu.memory_space<semaphore_mem>> -> memref<!tpu.dma_semaphore, #tpu.memory_space<semaphore_mem>>
    tpu.enqueue_dma source(%16 : memref<1x128xf32, #tpu.memory_space<any>>) target(%17 : memref<1x128xf32, #tpu.memory_space<vmem>>) target_semaphore(%19 : memref<!tpu.dma_semaphore, #tpu.memory_space<semaphore_mem>>)
    %c8_i32_12 = arith.constant 8 : i32
    %20 = arith.muli %arg0, %c8_i32_12 : i32
    %c2_i32 = arith.constant 2 : i32
    %21 = arith.addi %20, %c2_i32 : i32
    %22 = arith.index_cast %21 : i32 to index
    %23 = memref.load %arg1[%22] : memref<8xi32, #tpu.memory_space<smem>>
    %c0_i32_13 = arith.constant 0 : i32
    %24 = arith.maxsi %23, %c0_i32_13 : i32
    %c63_i32_14 = arith.constant 63 : i32
    %25 = arith.minsi %24, %c63_i32_14 : i32
    %c2_i32_15 = arith.constant 2 : i32
    %c0_i32_16 = arith.constant 0 : i32
    %26 = tpu.memref_slice %arg2[%25, %c0_i32_16] : memref<64x128xf32, #tpu.memory_space<any>> -> memref<1x128xf32, #tpu.memory_space<any>>
    %c2_i32_17 = arith.constant 2 : i32
    %c0_i32_18 = arith.constant 0 : i32
    %27 = tpu.memref_slice %arg6[%c2_i32_17, %c0_i32_18] : memref<8x128xf32, #tpu.memory_space<vmem>> -> memref<1x128xf32, #tpu.memory_space<vmem>>
    %28 = tpu.memref_slice %arg7[%c2_i32_15] : memref<8x!tpu.dma_semaphore, #tpu.memory_space<semaphore_mem>> -> memref<1x!tpu.dma_semaphore, #tpu.memory_space<semaphore_mem>>
    %29 = tpu.memref_squeeze %28 : memref<1x!tpu.dma_semaphore, #tpu.memory_space<semaphore_mem>> -> memref<!tpu.dma_semaphore, #tpu.memory_space<semaphore_mem>>
    tpu.enqueue_dma source(%26 : memref<1x128xf32, #tpu.memory_space<any>>) target(%27 : memref<1x128xf32, #tpu.memory_space<vmem>>) target_semaphore(%29 : memref<!tpu.dma_semaphore, #tpu.memory_space<semaphore_mem>>)
    %c8_i32_19 = arith.constant 8 : i32
    %30 = arith.muli %arg0, %c8_i32_19 : i32
    %c3_i32 = arith.constant 3 : i32
    %31 = arith.addi %30, %c3_i32 : i32
    %32 = arith.index_cast %31 : i32 to index
    %33 = memref.load %arg1[%32] : memref<8xi32, #tpu.memory_space<smem>>
    %c0_i32_20 = arith.constant 0 : i32
    %34 = arith.maxsi %33, %c0_i32_20 : i32
    %c63_i32_21 = arith.constant 63 : i32
    %35 = arith.minsi %34, %c63_i32_21 : i32
    %c3_i32_22 = arith.constant 3 : i32
    %c0_i32_23 = arith.constant 0 : i32
    %36 = tpu.memref_slice %arg2[%35, %c0_i32_23] : memref<64x128xf32, #tpu.memory_space<any>> -> memref<1x128xf32, #tpu.memory_space<any>>
    %c3_i32_24 = arith.constant 3 : i32
    %c0_i32_25 = arith.constant 0 : i32
    %37 = tpu.memref_slice %arg6[%c3_i32_24, %c0_i32_25] : memref<8x128xf32, #tpu.memory_space<vmem>> -> memref<1x128xf32, #tpu.memory_space<vmem>>
    %38 = tpu.memref_slice %arg7[%c3_i32_22] : memref<8x!tpu.dma_semaphore, #tpu.memory_space<semaphore_mem>> -> memref<1x!tpu.dma_semaphore, #tpu.memory_space<semaphore_mem>>
    %39 = tpu.memref_squeeze %38 : memref<1x!tpu.dma_semaphore, #tpu.memory_space<semaphore_mem>> -> memref<!tpu.dma_semaphore, #tpu.memory_space<semaphore_mem>>
    tpu.enqueue_dma source(%36 : memref<1x128xf32, #tpu.memory_space<any>>) target(%37 : memref<1x128xf32, #tpu.memory_space<vmem>>) target_semaphore(%39 : memref<!tpu.dma_semaphore, #tpu.memory_space<semaphore_mem>>)
    %c8_i32_26 = arith.constant 8 : i32
    %40 = arith.muli %arg0, %c8_i32_26 : i32
    %c4_i32 = arith.constant 4 : i32
    %41 = arith.addi %40, %c4_i32 : i32
    %42 = arith.index_cast %41 : i32 to index
    %43 = memref.load %arg1[%42] : memref<8xi32, #tpu.memory_space<smem>>
    %c0_i32_27 = arith.constant 0 : i32
    %44 = arith.maxsi %43, %c0_i32_27 : i32
    %c63_i32_28 = arith.constant 63 : i32
    %45 = arith.minsi %44, %c63_i32_28 : i32
    %c4_i32_29 = arith.constant 4 : i32
    %c0_i32_30 = arith.constant 0 : i32
    %46 = tpu.memref_slice %arg2[%45, %c0_i32_30] : memref<64x128xf32, #tpu.memory_space<any>> -> memref<1x128xf32, #tpu.memory_space<any>>
    %c4_i32_31 = arith.constant 4 : i32
    %c0_i32_32 = arith.constant 0 : i32
    %47 = tpu.memref_slice %arg6[%c4_i32_31, %c0_i32_32] : memref<8x128xf32, #tpu.memory_space<vmem>> -> memref<1x128xf32, #tpu.memory_space<vmem>>
    %48 = tpu.memref_slice %arg7[%c4_i32_29] : memref<8x!tpu.dma_semaphore, #tpu.memory_space<semaphore_mem>> -> memref<1x!tpu.dma_semaphore, #tpu.memory_space<semaphore_mem>>
    %49 = tpu.memref_squeeze %48 : memref<1x!tpu.dma_semaphore, #tpu.memory_space<semaphore_mem>> -> memref<!tpu.dma_semaphore, #tpu.memory_space<semaphore_mem>>
    tpu.enqueue_dma source(%46 : memref<1x128xf32, #tpu.memory_space<any>>) target(%47 : memref<1x128xf32, #tpu.memory_space<vmem>>) target_semaphore(%49 : memref<!tpu.dma_semaphore, #tpu.memory_space<semaphore_mem>>)
    %c8_i32_33 = arith.constant 8 : i32
    %50 = arith.muli %arg0, %c8_i32_33 : i32
    %c5_i32 = arith.constant 5 : i32
    %51 = arith.addi %50, %c5_i32 : i32
    %52 = arith.index_cast %51 : i32 to index
    %53 = memref.load %arg1[%52] : memref<8xi32, #tpu.memory_space<smem>>
    %c0_i32_34 = arith.constant 0 : i32
    %54 = arith.maxsi %53, %c0_i32_34 : i32
    %c63_i32_35 = arith.constant 63 : i32
    %55 = arith.minsi %54, %c63_i32_35 : i32
    %c5_i32_36 = arith.constant 5 : i32
    %c0_i32_37 = arith.constant 0 : i32
    %56 = tpu.memref_slice %arg2[%55, %c0_i32_37] : memref<64x128xf32, #tpu.memory_space<any>> -> memref<1x128xf32, #tpu.memory_space<any>>
    %c5_i32_38 = arith.constant 5 : i32
    %c0_i32_39 = arith.constant 0 : i32
    %57 = tpu.memref_slice %arg6[%c5_i32_38, %c0_i32_39] : memref<8x128xf32, #tpu.memory_space<vmem>> -> memref<1x128xf32, #tpu.memory_space<vmem>>
    %58 = tpu.memref_slice %arg7[%c5_i32_36] : memref<8x!tpu.dma_semaphore, #tpu.memory_space<semaphore_mem>> -> memref<1x!tpu.dma_semaphore, #tpu.memory_space<semaphore_mem>>
    %59 = tpu.memref_squeeze %58 : memref<1x!tpu.dma_semaphore, #tpu.memory_space<semaphore_mem>> -> memref<!tpu.dma_semaphore, #tpu.memory_space<semaphore_mem>>
    tpu.enqueue_dma source(%56 : memref<1x128xf32, #tpu.memory_space<any>>) target(%57 : memref<1x128xf32, #tpu.memory_space<vmem>>) target_semaphore(%59 : memref<!tpu.dma_semaphore, #tpu.memory_space<semaphore_mem>>)
    %c8_i32_40 = arith.constant 8 : i32
    %60 = arith.muli %arg0, %c8_i32_40 : i32
    %c6_i32 = arith.constant 6 : i32
    %61 = arith.addi %60, %c6_i32 : i32
    %62 = arith.index_cast %61 : i32 to index
    %63 = memref.load %arg1[%62] : memref<8xi32, #tpu.memory_space<smem>>
    %c0_i32_41 = arith.constant 0 : i32
    %64 = arith.maxsi %63, %c0_i32_41 : i32
    %c63_i32_42 = arith.constant 63 : i32
    %65 = arith.minsi %64, %c63_i32_42 : i32
    %c6_i32_43 = arith.constant 6 : i32
    %c0_i32_44 = arith.constant 0 : i32
    %66 = tpu.memref_slice %arg2[%65, %c0_i32_44] : memref<64x128xf32, #tpu.memory_space<any>> -> memref<1x128xf32, #tpu.memory_space<any>>
    %c6_i32_45 = arith.constant 6 : i32
    %c0_i32_46 = arith.constant 0 : i32
    %67 = tpu.memref_slice %arg6[%c6_i32_45, %c0_i32_46] : memref<8x128xf32, #tpu.memory_space<vmem>> -> memref<1x128xf32, #tpu.memory_space<vmem>>
    %68 = tpu.memref_slice %arg7[%c6_i32_43] : memref<8x!tpu.dma_semaphore, #tpu.memory_space<semaphore_mem>> -> memref<1x!tpu.dma_semaphore, #tpu.memory_space<semaphore_mem>>
    %69 = tpu.memref_squeeze %68 : memref<1x!tpu.dma_semaphore, #tpu.memory_space<semaphore_mem>> -> memref<!tpu.dma_semaphore, #tpu.memory_space<semaphore_mem>>
    tpu.enqueue_dma source(%66 : memref<1x128xf32, #tpu.memory_space<any>>) target(%67 : memref<1x128xf32, #tpu.memory_space<vmem>>) target_semaphore(%69 : memref<!tpu.dma_semaphore, #tpu.memory_space<semaphore_mem>>)
    %c8_i32_47 = arith.constant 8 : i32
    %70 = arith.muli %arg0, %c8_i32_47 : i32
    %c7_i32 = arith.constant 7 : i32
    %71 = arith.addi %70, %c7_i32 : i32
    %72 = arith.index_cast %71 : i32 to index
    %73 = memref.load %arg1[%72] : memref<8xi32, #tpu.memory_space<smem>>
    %c0_i32_48 = arith.constant 0 : i32
    %74 = arith.maxsi %73, %c0_i32_48 : i32
    %c63_i32_49 = arith.constant 63 : i32
    %75 = arith.minsi %74, %c63_i32_49 : i32
    %c7_i32_50 = arith.constant 7 : i32
    %c0_i32_51 = arith.constant 0 : i32
    %76 = tpu.memref_slice %arg2[%75, %c0_i32_51] : memref<64x128xf32, #tpu.memory_space<any>> -> memref<1x128xf32, #tpu.memory_space<any>>
    %c7_i32_52 = arith.constant 7 : i32
    %c0_i32_53 = arith.constant 0 : i32
    %77 = tpu.memref_slice %arg6[%c7_i32_52, %c0_i32_53] : memref<8x128xf32, #tpu.memory_space<vmem>> -> memref<1x128xf32, #tpu.memory_space<vmem>>
    %78 = tpu.memref_slice %arg7[%c7_i32_50] : memref<8x!tpu.dma_semaphore, #tpu.memory_space<semaphore_mem>> -> memref<1x!tpu.dma_semaphore, #tpu.memory_space<semaphore_mem>>
    %79 = tpu.memref_squeeze %78 : memref<1x!tpu.dma_semaphore, #tpu.memory_space<semaphore_mem>> -> memref<!tpu.dma_semaphore, #tpu.memory_space<semaphore_mem>>
    tpu.enqueue_dma source(%76 : memref<1x128xf32, #tpu.memory_space<any>>) target(%77 : memref<1x128xf32, #tpu.memory_space<vmem>>) target_semaphore(%79 : memref<!tpu.dma_semaphore, #tpu.memory_space<semaphore_mem>>)
    %c0_i32_54 = arith.constant 0 : i32
    %c0_i32_55 = arith.constant 0 : i32
    %c0_i32_56 = arith.constant 0 : i32
    %80 = tpu.memref_slice %arg2[%c0_i32_55, %c0_i32_56] : memref<64x128xf32, #tpu.memory_space<any>> -> memref<1x128xf32, #tpu.memory_space<any>>
    %c0_i32_57 = arith.constant 0 : i32
    %c0_i32_58 = arith.constant 0 : i32
    %81 = tpu.memref_slice %arg6[%c0_i32_57, %c0_i32_58] : memref<8x128xf32, #tpu.memory_space<vmem>> -> memref<1x128xf32, #tpu.memory_space<vmem>>
    %82 = tpu.memref_slice %arg7[%c0_i32_54] : memref<8x!tpu.dma_semaphore, #tpu.memory_space<semaphore_mem>> -> memref<1x!tpu.dma_semaphore, #tpu.memory_space<semaphore_mem>>
    %83 = tpu.memref_squeeze %82 : memref<1x!tpu.dma_semaphore, #tpu.memory_space<semaphore_mem>> -> memref<!tpu.dma_semaphore, #tpu.memory_space<semaphore_mem>>
    tpu.wait_dma2 semaphore(%83 : memref<!tpu.dma_semaphore, #tpu.memory_space<semaphore_mem>>) src(%80 : memref<1x128xf32, #tpu.memory_space<any>>) dst(%81 : memref<1x128xf32, #tpu.memory_space<vmem>>)
    %c1_i32_59 = arith.constant 1 : i32
    %c0_i32_60 = arith.constant 0 : i32
    %c0_i32_61 = arith.constant 0 : i32
    %84 = tpu.memref_slice %arg2[%c0_i32_60, %c0_i32_61] : memref<64x128xf32, #tpu.memory_space<any>> -> memref<1x128xf32, #tpu.memory_space<any>>
    %c1_i32_62 = arith.constant 1 : i32
    %c0_i32_63 = arith.constant 0 : i32
    %85 = tpu.memref_slice %arg6[%c1_i32_62, %c0_i32_63] : memref<8x128xf32, #tpu.memory_space<vmem>> -> memref<1x128xf32, #tpu.memory_space<vmem>>
    %86 = tpu.memref_slice %arg7[%c1_i32_59] : memref<8x!tpu.dma_semaphore, #tpu.memory_space<semaphore_mem>> -> memref<1x!tpu.dma_semaphore, #tpu.memory_space<semaphore_mem>>
    %87 = tpu.memref_squeeze %86 : memref<1x!tpu.dma_semaphore, #tpu.memory_space<semaphore_mem>> -> memref<!tpu.dma_semaphore, #tpu.memory_space<semaphore_mem>>
    tpu.wait_dma2 semaphore(%87 : memref<!tpu.dma_semaphore, #tpu.memory_space<semaphore_mem>>) src(%84 : memref<1x128xf32, #tpu.memory_space<any>>) dst(%85 : memref<1x128xf32, #tpu.memory_space<vmem>>)
    %c2_i32_64 = arith.constant 2 : i32
    %c0_i32_65 = arith.constant 0 : i32
    %c0_i32_66 = arith.constant 0 : i32
    %88 = tpu.memref_slice %arg2[%c0_i32_65, %c0_i32_66] : memref<64x128xf32, #tpu.memory_space<any>> -> memref<1x128xf32, #tpu.memory_space<any>>
    %c2_i32_67 = arith.constant 2 : i32
    %c0_i32_68 = arith.constant 0 : i32
    %89 = tpu.memref_slice %arg6[%c2_i32_67, %c0_i32_68] : memref<8x128xf32, #tpu.memory_space<vmem>> -> memref<1x128xf32, #tpu.memory_space<vmem>>
    %90 = tpu.memref_slice %arg7[%c2_i32_64] : memref<8x!tpu.dma_semaphore, #tpu.memory_space<semaphore_mem>> -> memref<1x!tpu.dma_semaphore, #tpu.memory_space<semaphore_mem>>
    %91 = tpu.memref_squeeze %90 : memref<1x!tpu.dma_semaphore, #tpu.memory_space<semaphore_mem>> -> memref<!tpu.dma_semaphore, #tpu.memory_space<semaphore_mem>>
    tpu.wait_dma2 semaphore(%91 : memref<!tpu.dma_semaphore, #tpu.memory_space<semaphore_mem>>) src(%88 : memref<1x128xf32, #tpu.memory_space<any>>) dst(%89 : memref<1x128xf32, #tpu.memory_space<vmem>>)
    %c3_i32_69 = arith.constant 3 : i32
    %c0_i32_70 = arith.constant 0 : i32
    %c0_i32_71 = arith.constant 0 : i32
    %92 = tpu.memref_slice %arg2[%c0_i32_70, %c0_i32_71] : memref<64x128xf32, #tpu.memory_space<any>> -> memref<1x128xf32, #tpu.memory_space<any>>
    %c3_i32_72 = arith.constant 3 : i32
    %c0_i32_73 = arith.constant 0 : i32
    %93 = tpu.memref_slice %arg6[%c3_i32_72, %c0_i32_73] : memref<8x128xf32, #tpu.memory_space<vmem>> -> memref<1x128xf32, #tpu.memory_space<vmem>>
    %94 = tpu.memref_slice %arg7[%c3_i32_69] : memref<8x!tpu.dma_semaphore, #tpu.memory_space<semaphore_mem>> -> memref<1x!tpu.dma_semaphore, #tpu.memory_space<semaphore_mem>>
    %95 = tpu.memref_squeeze %94 : memref<1x!tpu.dma_semaphore, #tpu.memory_space<semaphore_mem>> -> memref<!tpu.dma_semaphore, #tpu.memory_space<semaphore_mem>>
    tpu.wait_dma2 semaphore(%95 : memref<!tpu.dma_semaphore, #tpu.memory_space<semaphore_mem>>) src(%92 : memref<1x128xf32, #tpu.memory_space<any>>) dst(%93 : memref<1x128xf32, #tpu.memory_space<vmem>>)
    %c4_i32_74 = arith.constant 4 : i32
    %c0_i32_75 = arith.constant 0 : i32
    %c0_i32_76 = arith.constant 0 : i32
    %96 = tpu.memref_slice %arg2[%c0_i32_75, %c0_i32_76] : memref<64x128xf32, #tpu.memory_space<any>> -> memref<1x128xf32, #tpu.memory_space<any>>
    %c4_i32_77 = arith.constant 4 : i32
    %c0_i32_78 = arith.constant 0 : i32
    %97 = tpu.memref_slice %arg6[%c4_i32_77, %c0_i32_78] : memref<8x128xf32, #tpu.memory_space<vmem>> -> memref<1x128xf32, #tpu.memory_space<vmem>>
    %98 = tpu.memref_slice %arg7[%c4_i32_74] : memref<8x!tpu.dma_semaphore, #tpu.memory_space<semaphore_mem>> -> memref<1x!tpu.dma_semaphore, #tpu.memory_space<semaphore_mem>>
    %99 = tpu.memref_squeeze %98 : memref<1x!tpu.dma_semaphore, #tpu.memory_space<semaphore_mem>> -> memref<!tpu.dma_semaphore, #tpu.memory_space<semaphore_mem>>
    tpu.wait_dma2 semaphore(%99 : memref<!tpu.dma_semaphore, #tpu.memory_space<semaphore_mem>>) src(%96 : memref<1x128xf32, #tpu.memory_space<any>>) dst(%97 : memref<1x128xf32, #tpu.memory_space<vmem>>)
    %c5_i32_79 = arith.constant 5 : i32
    %c0_i32_80 = arith.constant 0 : i32
    %c0_i32_81 = arith.constant 0 : i32
    %100 = tpu.memref_slice %arg2[%c0_i32_80, %c0_i32_81] : memref<64x128xf32, #tpu.memory_space<any>> -> memref<1x128xf32, #tpu.memory_space<any>>
    %c5_i32_82 = arith.constant 5 : i32
    %c0_i32_83 = arith.constant 0 : i32
    %101 = tpu.memref_slice %arg6[%c5_i32_82, %c0_i32_83] : memref<8x128xf32, #tpu.memory_space<vmem>> -> memref<1x128xf32, #tpu.memory_space<vmem>>
    %102 = tpu.memref_slice %arg7[%c5_i32_79] : memref<8x!tpu.dma_semaphore, #tpu.memory_space<semaphore_mem>> -> memref<1x!tpu.dma_semaphore, #tpu.memory_space<semaphore_mem>>
    %103 = tpu.memref_squeeze %102 : memref<1x!tpu.dma_semaphore, #tpu.memory_space<semaphore_mem>> -> memref<!tpu.dma_semaphore, #tpu.memory_space<semaphore_mem>>
    tpu.wait_dma2 semaphore(%103 : memref<!tpu.dma_semaphore, #tpu.memory_space<semaphore_mem>>) src(%100 : memref<1x128xf32, #tpu.memory_space<any>>) dst(%101 : memref<1x128xf32, #tpu.memory_space<vmem>>)
    %c6_i32_84 = arith.constant 6 : i32
    %c0_i32_85 = arith.constant 0 : i32
    %c0_i32_86 = arith.constant 0 : i32
    %104 = tpu.memref_slice %arg2[%c0_i32_85, %c0_i32_86] : memref<64x128xf32, #tpu.memory_space<any>> -> memref<1x128xf32, #tpu.memory_space<any>>
    %c6_i32_87 = arith.constant 6 : i32
    %c0_i32_88 = arith.constant 0 : i32
    %105 = tpu.memref_slice %arg6[%c6_i32_87, %c0_i32_88] : memref<8x128xf32, #tpu.memory_space<vmem>> -> memref<1x128xf32, #tpu.memory_space<vmem>>
    %106 = tpu.memref_slice %arg7[%c6_i32_84] : memref<8x!tpu.dma_semaphore, #tpu.memory_space<semaphore_mem>> -> memref<1x!tpu.dma_semaphore, #tpu.memory_space<semaphore_mem>>
    %107 = tpu.memref_squeeze %106 : memref<1x!tpu.dma_semaphore, #tpu.memory_space<semaphore_mem>> -> memref<!tpu.dma_semaphore, #tpu.memory_space<semaphore_mem>>
    tpu.wait_dma2 semaphore(%107 : memref<!tpu.dma_semaphore, #tpu.memory_space<semaphore_mem>>) src(%104 : memref<1x128xf32, #tpu.memory_space<any>>) dst(%105 : memref<1x128xf32, #tpu.memory_space<vmem>>)
    %c7_i32_89 = arith.constant 7 : i32
    %c0_i32_90 = arith.constant 0 : i32
    %c0_i32_91 = arith.constant 0 : i32
    %108 = tpu.memref_slice %arg2[%c0_i32_90, %c0_i32_91] : memref<64x128xf32, #tpu.memory_space<any>> -> memref<1x128xf32, #tpu.memory_space<any>>
    %c7_i32_92 = arith.constant 7 : i32
    %c0_i32_93 = arith.constant 0 : i32
    %109 = tpu.memref_slice %arg6[%c7_i32_92, %c0_i32_93] : memref<8x128xf32, #tpu.memory_space<vmem>> -> memref<1x128xf32, #tpu.memory_space<vmem>>
    %110 = tpu.memref_slice %arg7[%c7_i32_89] : memref<8x!tpu.dma_semaphore, #tpu.memory_space<semaphore_mem>> -> memref<1x!tpu.dma_semaphore, #tpu.memory_space<semaphore_mem>>
    %111 = tpu.memref_squeeze %110 : memref<1x!tpu.dma_semaphore, #tpu.memory_space<semaphore_mem>> -> memref<!tpu.dma_semaphore, #tpu.memory_space<semaphore_mem>>
    tpu.wait_dma2 semaphore(%111 : memref<!tpu.dma_semaphore, #tpu.memory_space<semaphore_mem>>) src(%108 : memref<1x128xf32, #tpu.memory_space<any>>) dst(%109 : memref<1x128xf32, #tpu.memory_space<vmem>>)
    %c0 = arith.constant 0 : index
    %c0_94 = arith.constant 0 : index
    %112 = vector.load %arg6[%c0, %c0_94] : memref<8x128xf32, #tpu.memory_space<vmem>>, vector<8x128xf32>
    %cst = arith.constant dense<0.000000e+00> : vector<8xf32>
    %113 = vector.multi_reduction <add>, %112, %cst [1] : vector<8x128xf32> to vector<8xf32>
    %114 = vector.shape_cast %113 : vector<8xf32> to vector<8x1xf32>
    %cst_95 = arith.constant 1.280000e+02 : f32
    %115 = vector.broadcast %cst_95 : f32 to vector<8x1xf32>
    %116 = arith.divf %114, %115 : vector<8x1xf32>
    %117 = vector.broadcast %116 : vector<8x1xf32> to vector<8x128xf32>
    %118 = arith.subf %112, %117 : vector<8x128xf32>
    %119 = arith.mulf %118, %118 : vector<8x128xf32>
    %cst_96 = arith.constant dense<0.000000e+00> : vector<8xf32>
    %120 = vector.multi_reduction <add>, %119, %cst_96 [1] : vector<8x128xf32> to vector<8xf32>
    %121 = vector.shape_cast %120 : vector<8xf32> to vector<8x1xf32>
    %cst_97 = arith.constant 1.280000e+02 : f32
    %122 = vector.broadcast %cst_97 : f32 to vector<8x1xf32>
    %123 = arith.divf %121, %122 : vector<8x1xf32>
    %cst_98 = arith.constant 9.99999974E-6 : f32
    %124 = vector.broadcast %cst_98 : f32 to vector<8x1xf32>
    %125 = arith.addf %123, %124 : vector<8x1xf32>
    %126 = math.rsqrt %125 : vector<8x1xf32>
    %127 = vector.broadcast %126 : vector<8x1xf32> to vector<8x128xf32>
    %128 = arith.mulf %118, %127 : vector<8x128xf32>
    %c0_99 = arith.constant 0 : index
    %c0_100 = arith.constant 0 : index
    %129 = vector.load %arg3[%c0_99, %c0_100] : memref<1x128xf32, #tpu.memory_space<vmem>>, vector<1x128xf32>
    %130 = vector.broadcast %129 : vector<1x128xf32> to vector<8x128xf32>
    %131 = arith.mulf %128, %130 : vector<8x128xf32>
    %c0_101 = arith.constant 0 : index
    %c0_102 = arith.constant 0 : index
    %132 = vector.load %arg4[%c0_101, %c0_102] : memref<1x128xf32, #tpu.memory_space<vmem>>, vector<1x128xf32>
    %133 = vector.broadcast %132 : vector<1x128xf32> to vector<8x128xf32>
    %134 = arith.addf %131, %133 : vector<8x128xf32>
    %c0_103 = arith.constant 0 : index
    %c0_104 = arith.constant 0 : index
    %135 = vector.load %arg5[%c0_103, %c0_104] : memref<8x128xf32, #tpu.memory_space<vmem>>, vector<8x128xf32>
    tpu.vector_store %arg5[%c0_103, %c0_104], %134 {strides = array<i32>} : memref<8x128xf32, #tpu.memory_space<vmem>>, vector<8x128xf32>,
    return
  }
  func.func @transform_1(%arg0: i32, %arg1: memref<8xi32, #tpu.memory_space<smem>>) -> (i32, i32) {
    %c0_i32 = arith.constant 0 : i32
    %c0_i32_0 = arith.constant 0 : i32
    %c0_i32_1 = arith.constant 0 : i32
    return %c0_i32, %c0_i32_0 : i32, i32
  }
  func.func @transform_2(%arg0: i32, %arg1: memref<8xi32, #tpu.memory_space<smem>>) -> (i32, i32) {
    %c0_i32 = arith.constant 0 : i32
    %c0_i32_0 = arith.constant 0 : i32
    %c0_i32_1 = arith.constant 0 : i32
    return %c0_i32, %c0_i32_0 : i32, i32
  }
  func.func @transform_3(%arg0: i32, %arg1: memref<8xi32, #tpu.memory_space<smem>>) -> (i32, i32) {
    %c0_i32 = arith.constant 0 : i32
    %c0_i32_0 = arith.constant 0 : i32
    return %arg0, %c0_i32 : i32, i32
  }
}

</mosaic_0001>

<bundles_post_ra>
// kernel: tpu_custom_call.1
= control target key start
LH: loop header
LB: loop body
LE: loop exit
PB: predicated region body
PF: predicated region fallthrough
CT: control target
= control target key end

     0   :  { %s859_s0 = inlined_call_operand.hbm [shape: s32[8], index: 0, kind: input, shape index: {}]   ;;  %s860_s1 = inlined_call_operand.hbm [shape: f32[64,128], index: 1, kind: input, shape index: {}]   ;;  %s861_s2 = inlined_call_operand.vmem [shape: f32[1,128], index: 2, kind: input, shape index: {}]   ;;  %s862_s3 = inlined_call_operand.vmem [shape: f32[1,128], index: 3, kind: input, shape index: {}]   ;;  %s863_s4 = inlined_call_operand.hbm [shape: f32[8,128], index: 4, kind: output, shape index: {}]  }
   0x1   :  { %s409_s17 = scalar_lea.hbm %s859_s0, 16 }
   0x2   :  { %p410_p0 = scmp.ne.s32.totalorder %s859_s0, %s409_s17  ;;  %p413_p1 = scmp.lt.u32.totalorder %s409_s17, %s859_s0 }
   0x4   :  { %p415_p2 = pnand %p413_p1, %p410_p0 }
   0x6   :  { %418 = shalt.err (!%p415_p2)  }
   0x7   :  { %s653_s22 = smov [#allocation5]  }
   0x8   :  { %10 = dma.hbm_to_smem %s859_s0, 16, %s653_s22, [#allocation4] }
   0x9   :  { %633 = dma.done.wait [#allocation4], 16 }
   0xa   :  { %634 = vsyncadd [#allocation4], 4294967280 }
   0xb   :  { %12 = sfence }
   0xc   :  { %13 = vsyncpa [#allocation7], 0  ;;  %s19_s25 = sld [smem:[#allocation5]]  ;;  %s654_s26 = smov [#allocation2]  }
   0xd   :  { %s33_s27 = sshll.u32 %s654_s26, 4  ;;  %s322_s28 = sld [smem:[#allocation5 + $0x1]]  ;;  %s700_s27 = int_to_ptr.vmem [resolvable:$true] %s33_s27 }
   0xe   :  { %s655_s29 = smov [#allocation2 + $0x1]   ;;  %s702_s5 = sld [smem:[#allocation5 + $0x2]] }
   0xf   :  { %s54_s30 = sshll.u32 %s655_s29, 4  ;;  %s656_s6 = smov [#allocation2 + $0x2]   ;;  %s704_s30 = int_to_ptr.vmem [resolvable:$true] %s54_s30 }
  0x10   :  { %s706_s7 = sshll.u32 %s656_s6, 4  ;;  %s708_s0 = sld [smem:[#allocation5 + $0x3]]  ;;  %s76_s7 = int_to_ptr.vmem [resolvable:$true] %s706_s7 }
  0x11   :  { %s717_s16 = scalar_lea.hbm %s860_s1, 1024 }
  0x12   :  { %p20_p3 = scmp.gt.s32.totalorder %s19_s25, 0  ;;  %p316_p4 = scmp.lt.s32.totalorder %s19_s25, 63 }
  0x13   :  { %p39_p5 = scmp.gt.s32.totalorder %s322_s28, 0  ;;  %p323_p6 = scmp.lt.s32.totalorder %s322_s28, 63 }
  0x14   :  { %s866_s25 = smov (!%p20_p3, %s19_s25), 0  ;;  %p60_p7 = scmp.gt.s32.totalorder %s702_s5, 0 }
  0x15   :  { %s868_s28 = smov (!%p39_p5, %s322_s28), 0  ;;  %s870_s25 = smov (!%p316_p4, %s866_s25), 63 }
  0x16   :  { %s872_s28 = smov (!%p323_p6, %s868_s28), 63  ;;  %s321_s8 = sshll.u32 %s870_s25, 4 }
  0x17   :  { %s25_s11 = scalar_lea.hbm %s860_s1, %s321_s8  ;;  %s328_s12 = sshll.u32 %s872_s28, 4 }
  0x18   :  { %s419_s13 = scalar_lea.hbm %s25_s11, 16  ;;  %p422_p9 = scmp.lt.u32.totalorder %s25_s11, %s860_s1 }
  0x19   :  { %p420_p8 = scmp.ne.s32.totalorder %s25_s11, %s419_s13  ;;  %p423_p10 = scmp.lt.u32.totalorder %s717_s16, %s419_s13 }
  0x1a   :  { %p425_p12 = scmp.lt.u32.totalorder %s419_s13, %s25_s11 }
  0x1b   :  { %p424_p11 = por %p423_p10, %p422_p9 }
  0x1d   :  { %p426_p13 = por %p425_p12, %p424_p11 }
  0x1f   :  { %p427_p0 = pnand %p426_p13, %p420_p8 }
  0x21   :  { %430 = shalt.err (!%p427_p0)  }
  0x22   :  { %s431_s19 = scalar_lea.vmem %s700_s27, 16  ;;  %s726_s20 = scalar_lea.vmem %s700_s27, 128 }
  0x23   :  { %p432_p1 = scmp.ne.s32.totalorder %s700_s27, %s431_s19  ;;  %p436_p2 = scmp.lt.s32.totalorder %s700_s27, %s700_s27 }
  0x24   :  { %p437_p3 = scmp.lt.s32.totalorder %s726_s20, %s431_s19 }
  0x26   :  { %p438_p4 = por %p437_p3, %p436_p2 }
  0x28   :  { %p439_p5 = pnand %p438_p4, %p432_p1 }
  0x2a   :  { %442 = shalt.err (!%p439_p5)  }
  0x2b   :  { %36 = dma.hbm_to_vmem [thread:$0]  %s25_s11, 16, %s700_s27, [#allocation3] }
  0x2c   :  { %s44_s23 = scalar_lea.hbm %s860_s1, %s328_s12  ;;  %p330_p6 = scmp.lt.s32.totalorder %s702_s5, 63 }
  0x2d   :  { %s443_s24 = scalar_lea.hbm %s44_s23, 16  ;;  %p446_p9 = scmp.lt.u32.totalorder %s44_s23, %s860_s1 }
  0x2e   :  { %p444_p8 = scmp.ne.s32.totalorder %s44_s23, %s443_s24  ;;  %p447_p10 = scmp.lt.u32.totalorder %s717_s16, %s443_s24 }
  0x2f   :  { %p449_p12 = scmp.lt.u32.totalorder %s443_s24, %s44_s23 }
  0x30   :  { %p448_p11 = por %p447_p10, %p446_p9 }
  0x32   :  { %p450_p13 = por %p449_p12, %p448_p11 }
  0x34   :  { %p451_p0 = pnand %p450_p13, %p444_p8 }
  0x36   :  { %454 = shalt.err (!%p451_p0)  }
  0x37   :  { %s455_s28 = scalar_lea.vmem %s704_s30, 16  ;;  %p460_p2 = scmp.lt.s32.totalorder %s704_s30, %s700_s27 }
  0x38   :  { %p456_p1 = scmp.ne.s32.totalorder %s704_s30, %s455_s28  ;;  %p461_p3 = scmp.lt.s32.totalorder %s726_s20, %s455_s28 }
  0x3a   :  { %p462_p4 = por %p461_p3, %p460_p2 }
  0x3c   :  { %p463_p5 = pnand %p462_p4, %p456_p1 }
  0x3e   :  { %466 = shalt.err (!%p463_p5)  }
  0x3f   :  { %57 = dma.hbm_to_vmem [thread:$0]  %s44_s23, 16, %s704_s30, [#allocation3 + $0x1] }
  0x40   :  { %s61_s29 = scalar_select %p60_p7, %s702_s5, 0 }
  0x41   :  { %p81_p8 = scmp.gt.s32.totalorder %s708_s0, 0  ;;  %p337_p9 = scmp.lt.s32.totalorder %s708_s0, 63 }
  0x42   :  { %s874_s29 = smov (!%p330_p6, %s61_s29), 63 }
  0x43   :  { %s82_s6 = scalar_select %p81_p8, %s708_s0, 0 }
  0x44   :  { %s335_s8 = sshll.u32 %s874_s29, 4 }
  0x45   :  { %s65_s11 = scalar_lea.hbm %s860_s1, %s335_s8 }
  0x46   :  { %s467_s12 = scalar_lea.hbm %s65_s11, 16  ;;  %p470_p11 = scmp.lt.u32.totalorder %s65_s11, %s860_s1 }
  0x47   :  { %p468_p10 = scmp.ne.s32.totalorder %s65_s11, %s467_s12  ;;  %p471_p12 = scmp.lt.u32.totalorder %s717_s16, %s467_s12 }
  0x48   :  { %p473_p7 = scmp.lt.u32.totalorder %s467_s12, %s65_s11 }
  0x49   :  { %p472_p13 = por %p471_p12, %p470_p11 }
  0x4b   :  { %p474_p0 = por %p473_p7, %p472_p13 }
  0x4d   :  { %p475_p1 = pnand %p474_p0, %p468_p10 }
  0x4f   :  { %478 = shalt.err (!%p475_p1)  }
  0x50   :  { %s479_s30 = scalar_lea.vmem %s76_s7, 16  ;;  %p484_p2 = scmp.lt.s32.totalorder %s76_s7, %s700_s27 }
  0x51   :  { %p480_p6 = scmp.ne.s32.totalorder %s76_s7, %s479_s30  ;;  %p485_p3 = scmp.lt.s32.totalorder %s726_s20, %s479_s30 }
  0x53   :  { %p486_p4 = por %p485_p3, %p484_p2 }
  0x55   :  { %p487_p5 = pnand %p486_p4, %p480_p6 }
  0x57   :  { %490 = shalt.err (!%p487_p5)  }
  0x58   :  { %78 = dma.hbm_to_vmem [thread:$0]  %s65_s11, 16, %s76_s7, [#allocation3 + $0x2] }
  0x59   :  { %s876_s6 = smov (!%p337_p9, %s82_s6), 63  ;;  %s657_s5 = smov [#allocation2 + $0x3]  }
  0x5a   :  { %s96_s15 = sshll.u32 %s657_s5, 4  ;;  %s766_s17 = sld [smem:[#allocation5 + $0x4]]  ;;  %s97_s15 = int_to_ptr.vmem [resolvable:$true] %s96_s15 }
  0x5b   :  { %s342_s18 = sshll.u32 %s876_s6, 4 }
  0x5c   :  { %s86_s22 = scalar_lea.hbm %s860_s1, %s342_s18 }
  0x5d   :  { %s491_s23 = scalar_lea.hbm %s86_s22, 16  ;;  %p494_p10 = scmp.lt.u32.totalorder %s86_s22, %s860_s1 }
  0x5e   :  { %p492_p8 = scmp.ne.s32.totalorder %s86_s22, %s491_s23  ;;  %p495_p11 = scmp.lt.u32.totalorder %s717_s16, %s491_s23 }
  0x5f   :  { %p497_p13 = scmp.lt.u32.totalorder %s491_s23, %s86_s22 }
  0x60   :  { %p496_p12 = por %p495_p11, %p494_p10 }
  0x62   :  { %p498_p9 = por %p497_p13, %p496_p12 }
  0x64   :  { %p499_p7 = pnand %p498_p9, %p492_p8 }
  0x66   :  { %502 = shalt.err (!%p499_p7)  }
  0x67   :  { %s503_s7 = scalar_lea.vmem %s97_s15, 16  ;;  %p508_p1 = scmp.lt.s32.totalorder %s97_s15, %s700_s27 }
  0x68   :  { %p504_p0 = scmp.ne.s32.totalorder %s97_s15, %s503_s7  ;;  %p509_p6 = scmp.lt.s32.totalorder %s726_s20, %s503_s7 }
  0x6a   :  { %p510_p2 = por %p509_p6, %p508_p1 }
  0x6c   :  { %p511_p3 = pnand %p510_p2, %p504_p0 }
  0x6e   :  { %514 = shalt.err (!%p511_p3)  }
  0x6f   :  { %99 = dma.hbm_to_vmem [thread:$0]  %s86_s22, 16, %s97_s15, [#allocation3 + $0x3] }
  0x70   :  { %s777_s0 = sld [smem:[#allocation5 + $0x5]]  ;;  %s658_s26 = smov [#allocation2 + $0x4]  }
  0x71   :  { %s117_s28 = sshll.u32 %s658_s26, 4  ;;  %p102_p4 = scmp.gt.s32.totalorder %s766_s17, 0  ;;  %s118_s28 = int_to_ptr.vmem [resolvable:$true] %s117_s28 }
  0x72   :  { %p344_p5 = scmp.lt.s32.totalorder %s766_s17, 63  ;;  %s781_s29 = sld [smem:[#allocation5 + $0x6]] }
  0x73   :  { %s878_s17 = smov (!%p102_p4, %s766_s17), 0  ;;  %s659_s6 = smov [#allocation2 + $0x5]  }
  0x74   :  { %s138_s8 = sshll.u32 %s659_s6, 4  ;;  %s880_s17 = smov (!%p344_p5, %s878_s17), 63  ;;  %s139_s8 = int_to_ptr.vmem [resolvable:$true] %s138_s8 }
  0x75   :  { %s349_s9 = sshll.u32 %s880_s17, 4 }
  0x76   :  { %p123_p8 = scmp.gt.s32.totalorder %s777_s0, 0  ;;  %s107_s12 = scalar_lea.hbm %s860_s1, %s349_s9 }
  0x77   :  { %s515_s13 = scalar_lea.hbm %s107_s12, 16  ;;  %p518_p13 = scmp.lt.u32.totalorder %s107_s12, %s860_s1 }
  0x78   :  { %p144_p11 = scmp.gt.s32.totalorder %s781_s29, 0  ;;  %p516_p12 = scmp.ne.s32.totalorder %s107_s12, %s515_s13 }
  0x79   :  { %p519_p9 = scmp.lt.u32.totalorder %s717_s16, %s515_s13  ;;  %p521_p0 = scmp.lt.u32.totalorder %s515_s13, %s107_s12 }
  0x7b   :  { %p520_p7 = por %p519_p9, %p518_p13 }
  0x7d   :  { %p522_p1 = por %p521_p0, %p520_p7 }
  0x7f   :  { %p523_p6 = pnand %p522_p1, %p516_p12 }
  0x81   :  { %526 = shalt.err (!%p523_p6)  }
  0x82   :  { %s527_s5 = scalar_lea.vmem %s118_s28, 16  ;;  %p532_p3 = scmp.lt.s32.totalorder %s118_s28, %s700_s27 }
  0x83   :  { %p528_p2 = scmp.ne.s32.totalorder %s118_s28, %s527_s5  ;;  %p533_p4 = scmp.lt.s32.totalorder %s726_s20, %s527_s5 }
  0x85   :  { %p534_p5 = por %p533_p4, %p532_p3 }
  0x87   :  { %p535_p10 = pnand %p534_p5, %p528_p2 }
  0x89   :  { %538 = shalt.err (!%p535_p10)  }
  0x8a   :  { %120 = dma.hbm_to_vmem [thread:$0]  %s107_s12, 16, %s118_s28, [#allocation3 + $0x4] }
  0x8b   :  { %s124_s15 = scalar_select %p123_p8, %s777_s0, 0 }
  0x8c   :  { %s145_s17 = scalar_select %p144_p11, %s781_s29, 0 }
  0x8d   :  { %p864_p12 = scmp.lt.s32.totalorder %s777_s0, 63  ;;  %p358_p13 = scmp.lt.s32.totalorder %s781_s29, 63 }
  0x8e   :  { %s805_s19 = sld [smem:[#allocation5 + $0x7]]  ;;  %s660_s24 = smov [#allocation2 + $0x6]  }
  0x8f   :  { %s882_s15 = smov (!%p864_p12, %s124_s15), 63  ;;  %s159_s25 = sshll.u32 %s660_s24, 4  ;;  %s160_s25 = int_to_ptr.vmem [resolvable:$true] %s159_s25 }
  0x90   :  { %s356_s18 = sshll.u32 %s882_s15, 4 }
  0x91   :  { %s128_s23 = scalar_lea.hbm %s860_s1, %s356_s18 }
  0x92   :  { %s539_s7 = scalar_lea.hbm %s128_s23, 16  ;;  %p542_p8 = scmp.lt.u32.totalorder %s128_s23, %s860_s1 }
  0x93   :  { %p540_p10 = scmp.ne.s32.totalorder %s128_s23, %s539_s7  ;;  %p543_p11 = scmp.lt.u32.totalorder %s717_s16, %s539_s7 }
  0x94   :  { %p545_p7 = scmp.lt.u32.totalorder %s539_s7, %s128_s23 }
  0x95   :  { %p544_p9 = por %p543_p11, %p542_p8 }
  0x97   :  { %p546_p0 = por %p545_p7, %p544_p9 }
  0x99   :  { %p547_p1 = pnand %p546_p0, %p540_p10 }
  0x9b   :  { %550 = shalt.err (!%p547_p1)  }
  0x9c   :  { %s551_s0 = scalar_lea.vmem %s139_s8, 16  ;;  %p556_p2 = scmp.lt.s32.totalorder %s139_s8, %s700_s27 }
  0x9d   :  { %p552_p6 = scmp.ne.s32.totalorder %s139_s8, %s551_s0  ;;  %p557_p3 = scmp.lt.s32.totalorder %s726_s20, %s551_s0 }
  0x9f   :  { %p558_p4 = por %p557_p3, %p556_p2 }
  0xa1   :  { %p559_p5 = pnand %p558_p4, %p552_p6 }
  0xa3   :  { %562 = shalt.err (!%p559_p5)  }
  0xa4   :  { %141 = dma.hbm_to_vmem [thread:$0]  %s128_s23, 16, %s139_s8, [#allocation3 + $0x5] }
  0xa5   :  { %s884_s17 = smov (!%p358_p13, %s145_s17), 63  ;;  %p165_p12 = scmp.gt.s32.totalorder %s805_s19, 0 }
  0xa6   :  { %s363_s6 = sshll.u32 %s884_s17, 4 }
  0xa7   :  { %s149_s11 = scalar_lea.hbm %s860_s1, %s363_s6 }
  0xa8   :  { %s563_s12 = scalar_lea.hbm %s149_s11, 16  ;;  %p566_p8 = scmp.lt.u32.totalorder %s149_s11, %s860_s1 }
  0xa9   :  { %p564_p10 = scmp.ne.s32.totalorder %s149_s11, %s563_s12  ;;  %p567_p11 = scmp.lt.u32.totalorder %s717_s16, %s563_s12 }
  0xaa   :  { %p569_p7 = scmp.lt.u32.totalorder %s563_s12, %s149_s11 }
  0xab   :  { %p568_p9 = por %p567_p11, %p566_p8 }
  0xad   :  { %p570_p0 = por %p569_p7, %p568_p9 }
  0xaf   :  { %p571_p1 = pnand %p570_p0, %p564_p10 }
  0xb1   :  { %574 = shalt.err (!%p571_p1)  }
  0xb2   :  { %s575_s29 = scalar_lea.vmem %s160_s25, 16  ;;  %p580_p6 = scmp.lt.s32.totalorder %s160_s25, %s700_s27 }
  0xb3   :  { %p576_p13 = scmp.ne.s32.totalorder %s160_s25, %s575_s29  ;;  %p581_p2 = scmp.lt.s32.totalorder %s726_s20, %s575_s29 }
  0xb5   :  { %p582_p3 = por %p581_p2, %p580_p6 }
  0xb7   :  { %p583_p4 = pnand %p582_p3, %p576_p13 }
  0xb9   :  { %586 = shalt.err (!%p583_p4)  }
  0xba   :  { %162 = dma.hbm_to_vmem [thread:$0]  %s149_s11, 16, %s160_s25, [#allocation3 + $0x6] }
  0xbb   :  { %s166_s8 = scalar_select %p165_p12, %s805_s19, 0 }
  0xbc   :  { %p365_p5 = scmp.lt.s32.totalorder %s805_s19, 63  ;;  %s661_s30 = smov [#allocation2 + $0x7]  }
  0xbd   :  { %s180_s5 = sshll.u32 %s661_s30, 4  ;;  %s181_s5 = int_to_ptr.vmem [resolvable:$true] %s180_s5 }
  0xbe   :  { %s886_s8 = smov (!%p365_p5, %s166_s8), 63 }
  0xbf   :  { %s370_s15 = sshll.u32 %s886_s8, 4 }
  0xc0   :  { %s170_s21 = scalar_lea.hbm %s860_s1, %s370_s15 }
  0xc1   :  { %s587_s22 = scalar_lea.hbm %s170_s21, 16  ;;  %p590_p8 = scmp.lt.u32.totalorder %s170_s21, %s860_s1 }
  0xc2   :  { %p588_p10 = scmp.ne.s32.totalorder %s170_s21, %s587_s22  ;;  %p591_p11 = scmp.lt.u32.totalorder %s717_s16, %s587_s22 }
  0xc3   :  { %p593_p7 = scmp.lt.u32.totalorder %s587_s22, %s170_s21 }
  0xc4   :  { %p592_p9 = por %p591_p11, %p590_p8 }
  0xc6   :  { %p594_p12 = por %p593_p7, %p592_p9 }
  0xc8   :  { %p595_p0 = pnand %p594_p12, %p588_p10 }
  0xca   :  { %598 = shalt.err (!%p595_p0)  }
  0xcb   :  { %s599_s19 = scalar_lea.vmem %s181_s5, 16  ;;  %p604_p13 = scmp.lt.s32.totalorder %s181_s5, %s700_s27 }
  0xcc   :  { %p600_p1 = scmp.ne.s32.totalorder %s181_s5, %s599_s19  ;;  %p605_p6 = scmp.lt.s32.totalorder %s726_s20, %s599_s19 }
  0xce   :  { %p606_p2 = por %p605_p6, %p604_p13 }
  0xd0   :  { %p607_p3 = pnand %p606_p2, %p600_p1 }
  0xd2   :  { %610 = shalt.err (!%p607_p3)  }
  0xd3   :  { %183 = dma.hbm_to_vmem [thread:$0]  %s170_s21, 16, %s181_s5, [#allocation3 + $0x7] }
  0xd4   :  { %635 = dma.done.wait [#allocation3], 16 }
  0xd5   :  { %636 = vsyncadd [#allocation3], 4294967280 }
  0xd6   :  { %637 = dma.done.wait [#allocation3 + $0x1], 16 }
  0xd7   :  { %638 = vsyncadd [#allocation3 + $0x1], 4294967280 }
  0xd8   :  { %639 = dma.done.wait [#allocation3 + $0x2], 16 }
  0xd9   :  { %640 = vsyncadd [#allocation3 + $0x2], 4294967280 }
  0xda   :  { %641 = dma.done.wait [#allocation3 + $0x3], 16 }
  0xdb   :  { %642 = vsyncadd [#allocation3 + $0x3], 4294967280 }
  0xdc   :  { %643 = dma.done.wait [#allocation3 + $0x4], 16 }
  0xdd   :  { %644 = vsyncadd [#allocation3 + $0x4], 4294967280 }
  0xde   :  { %645 = dma.done.wait [#allocation3 + $0x5], 16 }
  0xdf   :  { %646 = vsyncadd [#allocation3 + $0x5], 4294967280 }
  0xe0   :  { %647 = dma.done.wait [#allocation3 + $0x6], 16 }
  0xe1   :  { %648 = vsyncadd [#allocation3 + $0x6], 4294967280 }
  0xe2   :  { %649 = dma.done.wait [#allocation3 + $0x7], 16 }
  0xe3   :  { %650 = vsyncadd [#allocation3 + $0x7], 4294967280  ;;  %v201_v0 = vld [vmem:[#allocation2] sm:$0xff]  ;;  %s662_s25 = smov [#allocation6]  }
  0xe4   :  { %202 = vadd.xlane.f32.xlu0 %v201_v0  ;;  %v371_v9 = vld [vmem:[%s861_s2] ss:$0 sm:$0xff]  ;;  %s237_s7 = sshll.u32 %s662_s25, 4  ;;  %s238_s7 = int_to_ptr.vmem [resolvable:$true] %s237_s7 }
  0xe5   :  { %v372_v11 = vld [vmem:[%s862_s3] ss:$0 sm:$0xff]  ;;  %s611_s26 = scalar_lea.vmem %s238_s7, 128  ;;  %p616_p5 = scmp.lt.s32.totalorder %s238_s7, %s238_s7 }
  0xe6   :  { %p612_p4 = scmp.ne.s32.totalorder %s238_s7, %s611_s26  ;;  %p617_p10 = scmp.lt.s32.totalorder %s611_s26, %s611_s26 }
  0xe8   :  { %p618_p8 = por %p617_p10, %p616_p5 }
  0xea   :  { %p619_p11 = pnand %p618_p8, %p612_p4 }
 0x171   :  { %v203_v1 = vpop.xlane.xlu0 %202 }
 0x172   :  { %v205_v2 = vmul.f32 0.0078125, %v203_v1 }
 0x174   :  { %v206_v3 = vsub.f32 %v201_v0, %v205_v2 }
 0x176   :  { %v207_v4 = vmul.f32 %v206_v3, %v206_v3 }
 0x178   :  { %208 = vadd.xlane.f32.xlu0 %v207_v4 }
 0x205   :  { %v209_v5 = vpop.xlane.xlu0 %208 }
 0x206   :  { %v210_v6 = vmul.f32 0.0078125, %v209_v5 }
 0x208   :  { %v211_v7 = vadd.f32 1e-05, %v210_v6 }
 0x20a   :  { %407 = vrsqrt.f32 %v211_v7 }
 0x214   :  { %v408_v8 = vpop.eup %407 }
 0x215   :  { %v213_v10 = vmul.f32 %v408_v8, %v206_v3 }
 0x217   :  { %v221_v12 = vmul.f32 %v371_v9, %v213_v10 }
 0x219   :  { %v229_v13 = vadd.f32 %v372_v11, %v221_v12 }
 0x21b   :  { %230 = vst [vmem:[#allocation6] sm:$0xff] %v229_v13 }
 0x21c   :  { %622 = shalt.err (!%p619_p11)
}
 0x21d   :  { %s623_s0 = scalar_lea.hbm %s863_s4, 128 }
 0x21e   :  { %p624_p9 = scmp.ne.s32.totalorder %s863_s4, %s623_s0  ;;  %p627_p7 = scmp.lt.u32.totalorder %s623_s0, %s863_s4 }
 0x220   :  { %p629_p12 = pnand %p627_p7, %p624_p9 }
 0x222   :  { %632 = shalt.err (!%p629_p12)
}
 0x223   :  { %240 = dma.vmem_to_hbm [thread:$0]  %s238_s7, 128, %s863_s4, [#allocation7]  }
 0x224   :  { %651 = dma.done.wait [#allocation7], 128  }
 0x225   :  { %652 = vsyncadd [#allocation7], 4294967168 }
 0x226   :  { %244 = vsyncpa [#allocation7], 1 }
 0x227   :  { %245 = vsyncmov [#allocation3] }
 0x22a   :  { %s246_s13 = vpop.sfrf %245 }
 0x22b   :  { %p373_p0 = scmp.ne.s32.totalorder %s246_s13, 0 }
 0x22d   :  { %250 = shalt.err (%p373_p0)  }
 0x22e   :  { %252 = vsyncmov [#allocation3 + $0x1] }
 0x231   :  { %s253_s14 = vpop.sfrf %252 }
 0x232   :  { %p374_p1 = scmp.ne.s32.totalorder %s253_s14, 0 }
 0x234   :  { %257 = shalt.err (%p374_p1)  }
 0x235   :  { %259 = vsyncmov [#allocation3 + $0x2] }
 0x238   :  { %s260_s29 = vpop.sfrf %259 }
 0x239   :  { %p375_p13 = scmp.ne.s32.totalorder %s260_s29, 0 }
 0x23b   :  { %264 = shalt.err (%p375_p13)  }
 0x23c   :  { %266 = vsyncmov [#allocation3 + $0x3] }
 0x23f   :  { %s267_s8 = vpop.sfrf %266 }
 0x240   :  { %p376_p6 = scmp.ne.s32.totalorder %s267_s8, 0 }
 0x242   :  { %271 = shalt.err (%p376_p6)  }
 0x243   :  { %273 = vsyncmov [#allocation3 + $0x4] }
 0x246   :  { %s274_s4 = vpop.sfrf %273 }
 0x247   :  { %p377_p2 = scmp.ne.s32.totalorder %s274_s4, 0 }
 0x249   :  { %278 = shalt.err (%p377_p2)  }
 0x24a   :  { %280 = vsyncmov [#allocation3 + $0x5] }
 0x24d   :  { %s281_s30 = vpop.sfrf %280 }
 0x24e   :  { %p378_p3 = scmp.ne.s32.totalorder %s281_s30, 0 }
 0x250   :  { %285 = shalt.err (%p378_p3)  }
 0x251   :  { %287 = vsyncmov [#allocation3 + $0x6] }
 0x254   :  { %s288_s5 = vpop.sfrf %287 }
 0x255   :  { %p379_p4 = scmp.ne.s32.totalorder %s288_s5, 0 }
 0x257   :  { %292 = shalt.err (%p379_p4)  }
 0x258   :  { %294 = vsyncmov [#allocation3 + $0x7] }
 0x25b   :  { %s295_s15 = vpop.sfrf %294 }
 0x25c   :  { %p380_p5 = scmp.ne.s32.totalorder %s295_s15, 0 }
 0x25e   :  { %299 = shalt.err (%p380_p5)  }

</bundles_post_ra>
